<compile_context>
chip_gen: v6e
topology: v6e:2x2x1
jax: 0.10.0
libtpu: 0.0.40
codegen_flags: <defaults>
</compile_context>

<pallas_src>
import functools

import jax
import jax.numpy as jnp
from jax.experimental import pallas as pl
from jax.experimental.pallas import tpu as pltpu

_EPSILON = 1e-6
_LANES = 128
_SUBLANES = 8
_ROW_ALIGN = 32          # valid sublane blocking for f32 / bf16 / int8 inputs


def _pow_static(x, gamma):
    """jnp.power specialized at trace time (gamma is a Python float)."""
    g = float(gamma)
    if g == 0.0:
        return jnp.ones_like(x)           # matches torch.pow(x, 0) == 1
    if g.is_integer() and 1.0 <= g <= 8.0:
        r = x
        for _ in range(int(g) - 1):
            r = r * x                     # VPU multiplies, no EUP traffic
        return r
    return jnp.power(x, gamma)            # generic fallback (non-integer gamma)


def _loss_terms(p, t, gamma, c_pos, c_neg):
    """Per-element focal loss with alpha/weight/sign folded into c_pos/c_neg."""
    loss = jnp.zeros_like(p)
    if c_pos != 0.0:   # c_pos = -alpha * weight
        loss = loss + (c_pos * _pow_static(1.0 - p, gamma)) * (
            t * jnp.log(p + _EPSILON))
    if c_neg != 0.0:   # c_neg = -(1 - alpha) * weight (zero for default alpha=1)
        loss = loss + (c_neg * _pow_static(p, gamma)) * (
            (1.0 - t) * jnp.log(1.0 - p + _EPSILON))
    return loss


def _focal_kernel(p_ref, t_ref, out_ref, *, gamma, c_pos, c_neg,
                  rows, tr, tiles_per_core, num_blocks, c_split):
    c_idx = pl.program_id(0)
    t_idx = pl.program_id(1)

    @pl.when(t_idx == 0)
    def _init():
        out_ref[...] = jnp.zeros_like(out_ref)

    # Upcast in-kernel: HBM traffic stays at the native (possibly narrow) width.
    p = p_ref[...].astype(jnp.float32)
    t = t_ref[...].astype(jnp.float32)

    loss = _loss_terms(p, t, gamma, c_pos, c_neg)

    def _accum(vals):
        # Vreg-shaped partial accumulation straight into the resident output
        # block: only VPU adds per step (f32 accumulator; for extreme element
        # counts a second accumulation level could be added).
        out_ref[...] += vals.reshape(-1, _SUBLANES, _LANES).sum(axis=0)

    has_overhang = c_split * tiles_per_core > num_blocks      # trace-time bool
    has_partial = (rows % tr) != 0                            # trace-time bool

    if not has_overhang and not has_partial:
        # Fast path: every tile is full and valid -> no mask work at all.
        _accum(loss)
    else:
        tile = c_idx * tiles_per_core + t_idx     # logical tile index (small i32)
        rem = rows - tile * tr                    # rows remaining from this tile

        @pl.when(rem >= tr)
        def _full():                              # bulk tiles: no per-element mask
            _accum(loss)

        if has_partial:
            @pl.when(jnp.logical_and(rem > 0, rem < tr))
            def _boundary():                      # at most one tile per call
                row_ids = jax.lax.broadcasted_iota(jnp.int32, (tr, _LANES), 0)
                # where() discards any NaN/Inf produced from the DMA-padded
                # garbage rows of the partial block.
                _accum(jnp.where(row_ids < rem, loss, jnp.float32(0.0)))
        # rem <= 0: core-split overhang duplicate tile -> contributes nothing.


def _prep_dtype(x):
    """Keep narrow/native dtypes on the wire; upcast only when unavoidable."""
    if x.dtype in (jnp.float32, jnp.bfloat16, jnp.int8, jnp.uint8):
        return x
    if x.dtype == jnp.bool_:
        return x.astype(jnp.int8)
    return x.astype(jnp.float32)


@functools.partial(
    jax.jit,
    static_argnames=("gamma", "alpha", "weight", "tile_rows", "num_cores",
                     "vmem_limit_bytes"))
def binary_focal_loss(preds, targets, *, gamma=2.0, alpha=1.0, weight=1.0,
                      tile_rows=4096, num_cores=2,
                      vmem_limit_bytes=48 * 1024 * 1024):
    """Mean binary focal loss over all elements of (N, C, L) inputs."""
    assert preds.shape == targets.shape
    total = int(preds.size)
    assert total > 0

    # Fold alpha, weight and the leading minus into trace-time constants.
    # TODO(synk): a non-scalar `weight` buffer (per-class tensor) is folded as
    # a scalar here; only scalar weights are supported.
    gamma = float(gamma)
    c_pos = -float(alpha) * float(weight)
    c_neg = -(1.0 - float(alpha)) * float(weight)

    flat_p = _prep_dtype(preds).reshape(-1)
    flat_t = _prep_dtype(targets).reshape(-1)

    tail = total % _LANES
    aligned = total - tail

    # <=127 trailing elements: tiny wrapper-side computation instead of a
    # whole-array jnp.pad copy of both tensors.
    tail_sum = jnp.float32(0.0)
    if tail:
        tp = flat_p[aligned:].astype(jnp.float32)
        tt = flat_t[aligned:].astype(jnp.float32)
        tail_sum = jnp.sum(_loss_terms(tp, tt, gamma, c_pos, c_neg))

    if aligned == 0:
        return tail_sum / total

    rows = aligned // _LANES
    # Zero-copy bitcast when total is 128-aligned (the common case).
    # TODO(synk): for ragged totals XLA may still materialize the prefix slice.
    p2 = flat_p[:aligned].reshape(rows, _LANES)
    t2 = flat_t[:aligned].reshape(rows, _LANES)

    # Tile height: multiple of 32 rows (valid blocking for f32/bf16/int8);
    # default 4096 rows -> 2 MiB f32 per input block, which amortizes the
    # per-grid-step overhead while fitting v7x's 64 MiB VMEM with headroom.
    max_tr = max(_ROW_ALIGN, (int(tile_rows) // _ROW_ALIGN) * _ROW_ALIGN)
    tr = min(max_tr, ((rows + _ROW_ALIGN - 1) // _ROW_ALIGN) * _ROW_ALIGN)
    num_blocks = (rows + tr - 1) // tr

    # Leading "parallel" axis: lets megacore-capable chips (v7x) split the
    # reduction across TensorCores; on single-TC chips (v5e/v6e) the only cost
    # is at most one duplicate block whose contribution is skipped by a scalar
    # pl.when (no per-tile mask work, unlike the previous version).
    # TODO(synk): on v7x, confirm via trace that "parallel" shards across both
    # TCs; otherwise switch this axis to pltpu.CORE_PARALLEL.
    c_split = num_cores if (num_cores > 1 and num_blocks >= num_cores) else 1
    tiles_per_core = (num_blocks + c_split - 1) // c_split

    kernel = functools.partial(
        _focal_kernel, gamma=gamma, c_pos=c_pos, c_neg=c_neg,
        rows=rows, tr=tr, tiles_per_core=tiles_per_core,
        num_blocks=num_blocks, c_split=c_split)

    def in_map(c, t):
        # Clamp so a core's overhang step maps to a valid block; its
        # contribution is skipped inside the kernel.
        return (jnp.minimum(c * tiles_per_core + t, num_blocks - 1), 0)

    partials = pl.pallas_call(
        kernel,
        out_shape=jax.ShapeDtypeStruct((c_split * _SUBLANES, _LANES),
                                       jnp.float32),
        grid_spec=pltpu.PrefetchScalarGridSpec(
            num_scalar_prefetch=0,
            grid=(c_split, tiles_per_core),
            in_specs=[
                pl.BlockSpec((tr, _LANES), in_map),
                pl.BlockSpec((tr, _LANES), in_map),
            ],
            out_specs=pl.BlockSpec((_SUBLANES, _LANES), lambda c, t: (c, 0)),
        ),
        compiler_params=pltpu.CompilerParams(
            dimension_semantics=("parallel", "arbitrary"),
            vmem_limit_bytes=int(vmem_limit_bytes)),
    )(p2, t2)

    # Tiny final reduction (<= num_cores * 8 * 128 elements) + mean.
    return (jnp.sum(partials) + tail_sum) / total


def _reference(preds, targets, gamma=2.0, alpha=1.0, weight=1.0):
    p = preds.astype(jnp.float32)
    t = targets.astype(jnp.float32)
    loss = -(alpha * jnp.power(1.0 - p, gamma) * t * jnp.log(p + _EPSILON)
             + (1.0 - alpha) * jnp.power(p, gamma) * (1.0 - t)
             * jnp.log(1.0 - p + _EPSILON))
    return (loss * weight).mean()


if __name__ == "__main__":
    key = jax.random.PRNGKey(0)
    k1, k2, k3, k4, k5, k6 = jax.random.split(key, 6)

    # 1) Spec-like (N,C,L)=(2,4,16): 128 elements, default module params
    #    (gamma=2, alpha=1, weight buffer = scalar 1.0).
    preds1 = jax.nn.sigmoid(jax.random.normal(k1, (2, 4, 16), jnp.float32))
    targets1 = (jax.random.uniform(k2, (2, 4, 16)) > 0.5).astype(jnp.float32)
    out1 = jax.block_until_ready(binary_focal_loss(preds1, targets1))
    ref1 = _reference(preds1, targets1)
    assert jnp.allclose(out1, ref1, rtol=1e-5, atol=1e-6), (out1, ref1)

    # 2) Ragged element count (800 = 6*128 + 32 tail), narrow dtypes streamed
    #    natively (bf16 preds, int8 targets), alpha<1 / weight!=1 so both loss
    #    branches run.
    preds2 = jax.nn.sigmoid(
        jax.random.normal(k3, (2, 4, 100), jnp.float32)).astype(jnp.bfloat16)
    targets2 = (jax.random.uniform(k4, (2, 4, 100)) > 0.5).astype(jnp.int8)
    out2 = jax.block_until_ready(
        binary_focal_loss(preds2, targets2, gamma=2.0, alpha=0.25, weight=0.7))
    ref2 = _reference(preds2, targets2, gamma=2.0, alpha=0.25, weight=0.7)
    assert jnp.allclose(out2, ref2, rtol=1e-5, atol=1e-6), (out2, ref2)

    # 3) Multi-tile: exercises the 2-way core split, the skipped overhang tile
    #    and the masked partial boundary tile (160 rows, 64-row tiles).
    preds3 = jax.nn.sigmoid(jax.random.normal(k5, (2, 8, 1280), jnp.float32))
    targets3 = (jax.random.uniform(k6, (2, 8, 1280)) > 0.5).astype(jnp.float32)
    out3 = jax.block_until_ready(
        binary_focal_loss(preds3, targets3, gamma=3.0, alpha=0.25, weight=1.3,
                          tile_rows=64))
    ref3 = _reference(preds3, targets3, gamma=3.0, alpha=0.25, weight=1.3)
    assert jnp.allclose(out3, ref3, rtol=1e-5, atol=1e-6), (out3, ref3)

    print("KERNEL_OK")
</pallas_src>

<mosaic_0001>
module attributes {stable_mosaic.version = 11 : i64} {
  func.func @_focal_kernel(%arg0: i32, %arg1: i32, %arg2: memref<32x128xf32, #tpu.memory_space<vmem>>, %arg3: memref<32x128xf32, #tpu.memory_space<vmem>>, %arg4: memref<8x128xf32, #tpu.memory_space<vmem>>) attributes {dimension_semantics = [#tpu.dimension_semantics<parallel>, #tpu.dimension_semantics<arbitrary>], iteration_bounds = array<i64: 1, 1>, scalar_prefetch = 0 : i64, scratch_operands = 0 : i64, tpu.core_type = #tpu.core_type<tc>, window_params = [{transform_indices = @transform_0, window_bounds = array<i64: 32, 128>}, {transform_indices = @transform_1, window_bounds = array<i64: 32, 128>}, {transform_indices = @transform_2, window_bounds = array<i64: 8, 128>}]} {
    %c0_i32 = arith.constant 0 : i32
    %0 = arith.cmpi eq, %arg1, %c0_i32 : i32
    %1 = arith.extui %0 : i1 to i32
    %c0_i32_0 = arith.constant 0 : i32
    %2 = arith.cmpi ne, %1, %c0_i32_0 : i32
    scf.if %2 {
      %cst_13 = arith.constant 0.000000e+00 : f32
      %29 = vector.broadcast %cst_13 : f32 to vector<8x128xf32>
      %c0_14 = arith.constant 0 : index
      %c0_15 = arith.constant 0 : index
      %30 = vector.load %arg4[%c0_14, %c0_15] : memref<8x128xf32, #tpu.memory_space<vmem>>, vector<8x128xf32>
      tpu.vector_store %arg4[%c0_14, %c0_15], %29 {strides = array<i32>} : memref<8x128xf32, #tpu.memory_space<vmem>>, vector<8x128xf32>,
    } else {
    }
    %c0 = arith.constant 0 : index
    %c0_1 = arith.constant 0 : index
    %3 = vector.load %arg2[%c0, %c0_1] : memref<32x128xf32, #tpu.memory_space<vmem>>, vector<32x128xf32>
    %c0_2 = arith.constant 0 : index
    %c0_3 = arith.constant 0 : index
    %4 = vector.load %arg3[%c0_2, %c0_3] : memref<32x128xf32, #tpu.memory_space<vmem>>, vector<32x128xf32>
    %cst = arith.constant 0.000000e+00 : f32
    %5 = vector.broadcast %cst : f32 to vector<32x128xf32>
    %cst_4 = arith.constant 1.000000e+00 : f32
    %6 = vector.broadcast %cst_4 : f32 to vector<32x128xf32>
    %7 = arith.subf %6, %3 : vector<32x128xf32>
    %8 = arith.mulf %7, %7 : vector<32x128xf32>
    %cst_5 = arith.constant -1.000000e+00 : f32
    %9 = vector.broadcast %cst_5 : f32 to vector<32x128xf32>
    %10 = arith.mulf %9, %8 : vector<32x128xf32>
    %cst_6 = arith.constant 9.99999997E-7 : f32
    %11 = vector.broadcast %cst_6 : f32 to vector<32x128xf32>
    %12 = arith.addf %3, %11 : vector<32x128xf32>
    %13 = math.log %12 : vector<32x128xf32>
    %14 = arith.mulf %4, %13 : vector<32x128xf32>
    %15 = arith.mulf %10, %14 : vector<32x128xf32>
    %16 = arith.addf %5, %15 : vector<32x128xf32>
    %c1_i32 = arith.constant 1 : i32
    %17 = arith.muli %arg0, %c1_i32 : i32
    %18 = arith.addi %17, %arg1 : i32
    %c32_i32 = arith.constant 32 : i32
    %19 = arith.muli %18, %c32_i32 : i32
    %c1_i32_7 = arith.constant 1 : i32
    %20 = arith.subi %c1_i32_7, %19 : i32
    %c32_i32_8 = arith.constant 32 : i32
    %21 = arith.cmpi sge, %20, %c32_i32_8 : i32
    %22 = arith.extui %21 : i1 to i32
    %c0_i32_9 = arith.constant 0 : i32
    %23 = arith.cmpi ne, %22, %c0_i32_9 : i32
    scf.if %23 {
      %c0_13 = arith.constant 0 : index
      %c0_14 = arith.constant 0 : index
      %29 = vector.load %arg4[%c0_13, %c0_14] : memref<8x128xf32, #tpu.memory_space<vmem>>, vector<8x128xf32>
      %30 = vector.shape_cast %16 : vector<32x128xf32> to vector<4x8x128xf32>
      %cst_15 = arith.constant dense<0.000000e+00> : vector<8x128xf32>
      %31 = vector.multi_reduction <add>, %30, %cst_15 [0] : vector<4x8x128xf32> to vector<8x128xf32>
      %32 = arith.addf %29, %31 : vector<8x128xf32>
      %c0_16 = arith.constant 0 : index
      %c0_17 = arith.constant 0 : index
      %33 = vector.load %arg4[%c0_16, %c0_17] : memref<8x128xf32, #tpu.memory_space<vmem>>, vector<8x128xf32>
      tpu.vector_store %arg4[%c0_16, %c0_17], %32 {strides = array<i32>} : memref<8x128xf32, #tpu.memory_space<vmem>>, vector<8x128xf32>,
    } else {
    }
    %c0_i32_10 = arith.constant 0 : i32
    %24 = arith.cmpi sgt, %20, %c0_i32_10 : i32
    %c32_i32_11 = arith.constant 32 : i32
    %25 = arith.cmpi slt, %20, %c32_i32_11 : i32
    %26 = arith.andi %24, %25 : i1
    %27 = arith.extui %26 : i1 to i32
    %c0_i32_12 = arith.constant 0 : i32
    %28 = arith.cmpi ne, %27, %c0_i32_12 : i32
    scf.if %28 {
      %29 = tpu.iota {dimensions = array<i32: 0>} : vector<32x128xi32>
      %30 = vector.broadcast %20 : i32 to vector<32x128xi32>
      %31 = arith.cmpi slt, %29, %30 : vector<32x128xi32>
      %cst_13 = arith.constant 0.000000e+00 : f32
      %32 = vector.broadcast %cst_13 : f32 to vector<32x128xf32>
      %33 = arith.select %31, %16, %32 : vector<32x128xi1>, vector<32x128xf32>
      %c0_14 = arith.constant 0 : index
      %c0_15 = arith.constant 0 : index
      %34 = vector.load %arg4[%c0_14, %c0_15] : memref<8x128xf32, #tpu.memory_space<vmem>>, vector<8x128xf32>
      %35 = vector.shape_cast %33 : vector<32x128xf32> to vector<4x8x128xf32>
      %cst_16 = arith.constant dense<0.000000e+00> : vector<8x128xf32>
      %36 = vector.multi_reduction <add>, %35, %cst_16 [0] : vector<4x8x128xf32> to vector<8x128xf32>
      %37 = arith.addf %34, %36 : vector<8x128xf32>
      %c0_17 = arith.constant 0 : index
      %c0_18 = arith.constant 0 : index
      %38 = vector.load %arg4[%c0_17, %c0_18] : memref<8x128xf32, #tpu.memory_space<vmem>>, vector<8x128xf32>
      tpu.vector_store %arg4[%c0_17, %c0_18], %37 {strides = array<i32>} : memref<8x128xf32, #tpu.memory_space<vmem>>, vector<8x128xf32>,
    } else {
    }
    return
  }
  func.func @transform_0(%arg0: i32, %arg1: i32) -> (i32, i32) {
    %c1_i32 = arith.constant 1 : i32
    %0 = arith.muli %arg0, %c1_i32 : i32
    %1 = arith.addi %0, %arg1 : i32
    %c0_i32 = arith.constant 0 : i32
    %2 = arith.minsi %1, %c0_i32 : i32
    %c0_i32_0 = arith.constant 0 : i32
    %c0_i32_1 = arith.constant 0 : i32
    return %2, %c0_i32_0 : i32, i32
  }
  func.func @transform_1(%arg0: i32, %arg1: i32) -> (i32, i32) {
    %c1_i32 = arith.constant 1 : i32
    %0 = arith.muli %arg0, %c1_i32 : i32
    %1 = arith.addi %0, %arg1 : i32
    %c0_i32 = arith.constant 0 : i32
    %2 = arith.minsi %1, %c0_i32 : i32
    %c0_i32_0 = arith.constant 0 : i32
    %c0_i32_1 = arith.constant 0 : i32
    return %2, %c0_i32_0 : i32, i32
  }
  func.func @transform_2(%arg0: i32, %arg1: i32) -> (i32, i32) {
    %c0_i32 = arith.constant 0 : i32
    %c0_i32_0 = arith.constant 0 : i32
    return %arg0, %c0_i32 : i32, i32
  }
}

</mosaic_0001>

<bundles_post_ra>
// kernel: binary_focal_loss.1
= control target key start
LH: loop header
LB: loop body
LE: loop exit
PB: predicated region body
PF: predicated region fallthrough
CT: control target
= control target key end

     0   :  { %v157_v3 = vlaneseq  ;;  %s214_s0 = inlined_call_operand.vmem [shape: f32[1,128], index: 0, kind: input, shape index: {}]   ;;  %s215_s1 = inlined_call_operand.vmem [shape: f32[1,128], index: 1, kind: input, shape index: {}]   ;;  %s216_s2 = inlined_call_operand.vmem [shape: f32[8,128], index: 2, kind: output, shape index: {}]  }
   0x1   :  { %v94_v0 = vld [vmem:[%s214_s0] sm:$0xff] }
   0x2   :  { %v114_v1 = vadd.f32 1e-06, %v94_v0  ;;  %v102_v2 = vsub.f32 1.0, %v94_v0  ;;  %v98_v6 = vld [vmem:[%s215_s1] sm:$0xff]  ;;  %v158_v7 = vshrl.u32 %v157_v3, 7 }
   0x4   :  { %188 = vlog2.f32 %v114_v1  ;;  %v106_v4 = vmul.f32 %v102_v2, %v102_v2  ;;  %vm163_vm0 = vcmp.lt.s32.totalorder %v158_v7, 1 }
   0x6   :  { %v110_v8 = vmul.f32 -1.0, %v106_v4 }
  0x11   :  { %v189_v5 = vpop.eup %188 }
  0x12   :  { %v119_v9 = vmul.f32 0.6931472, %v189_v5 }
  0x14   :  { %v126_v10 = vmul.f32 %v119_v9, %v98_v6 }
  0x16   :  { %v130_v11 = vmul.f32 %v126_v10, %v110_v8 }
  0x18   :  { %v167_v12 = vsel %vm163_vm0, %v130_v11, 0.0 }
  0x19   :  { %176 = vst [vmem:[%s216_s2] sm:$0xff] %v167_v12 }

</bundles_post_ra>
